<compile_context>
chip_gen: v5e
topology: v5e:2x2
jax: 0.10.0
libtpu: 0.0.40
codegen_flags: <defaults>
</compile_context>

<pallas_src>
import jax
import jax.numpy as jnp
from jax.experimental import pallas as pl
from jax.experimental.pallas import tpu as pltpu

NUM_CLASSES = 4
SMOOTH = 1.0
P = 1          # self.p (pow(1) is identity)
EPS = 1e-6

NCORES = 2          # leading parallel grid axis (megacore on v7x)
MAX_TILE_S = 4096   # lanes per spatial tile (multiple of 128)


def _round_up(x, m):
    return (x + m - 1) // m * m


def _dice_partial_kernel(pred_ref, label_ref, inter_ref, comb_ref):
    # pred_ref : (B, C, T) logits (native dtype)    label_ref: (B, T) int labels
    # inter_ref / comb_ref: (1, B, C) f32 resident accumulator blocks.
    t = pl.program_id(1)

    @pl.when(t == 0)
    def _():
        inter_ref[...] = jnp.zeros_like(inter_ref)
        comb_ref[...] = jnp.zeros_like(comb_ref)

    pred = pred_ref[...].astype(jnp.float32)          # cast in-kernel (bf16 ok)
    labels = label_ref[...].astype(jnp.int32)         # (B, T)
    B, C, T = pred.shape

    # softmax over the channel axis (dim=1 in the PyTorch module)
    m = jnp.max(pred, axis=1, keepdims=True)
    e = jnp.exp(pred - m)
    inv = pl.reciprocal(jnp.sum(e, axis=1, keepdims=True), approx=True)
    sm = e * inv                                      # (B, C, T)

    # one-hot without materializing an f32 (B, C, T) tensor
    cls = jax.lax.broadcasted_iota(jnp.int32, (B, C, T), 1)
    onehot = labels[:, None, :] == cls                # (B, C, T) bool
    valid = (labels >= 0)[:, None, :]                 # (B, 1, T) — padding mask

    inter_part = jnp.sum(jnp.where(onehot, sm, 0.0), axis=2)            # (B, C)
    comb_part = (jnp.sum(jnp.where(valid, sm, 0.0), axis=2)
                 + jnp.sum(onehot.astype(jnp.float32), axis=2))          # (B, C)

    inter_ref[...] += inter_part[None]
    comb_ref[...] += comb_part[None]


def _dice_finalize_kernel(inter_ref, comb_ref, out_ref):
    # inter_ref / comb_ref: (NCORES, B, C) f32 partials
    inter = jnp.sum(inter_ref[...], axis=0)           # (B, C)
    comb = jnp.sum(comb_ref[...], axis=0)             # (B, C)
    dice = 1.0 - (2.0 * inter + SMOOTH) / (comb + SMOOTH + EPS)
    # weight is None, reduction == 'mean'
    out_ref[0, 0] = jnp.mean(dice)


def dice_loss(y_pred, y_true):
    """y_pred: (B, C, H, W) float logits (f32 or bf16); y_true: (B, H, W) int labels.
    Returns scalar mean dice loss (matches DiceLoss.forward with defaults)."""
    B, C, H, W = y_pred.shape
    assert C == NUM_CLASSES
    S = H * W

    tile_s = min(MAX_TILE_S, _round_up(pl.cdiv(S, NCORES), 128))
    s_pad = _round_up(S, NCORES * tile_s)
    tiles_per_core = s_pad // (NCORES * tile_s)

    pred3 = y_pred.reshape(B, C, S)                   # native dtype, no widening
    lab2 = y_true.reshape(B, S)
    if not jnp.issubdtype(lab2.dtype, jnp.signedinteger):
        lab2 = lab2.astype(jnp.int32)
    if s_pad != S:
        pred3 = jnp.pad(pred3, ((0, 0), (0, 0), (0, s_pad - S)))
        lab2 = jnp.pad(lab2, ((0, 0), (0, s_pad - S)), constant_values=-1)

    inter_part, comb_part = pl.pallas_call(
        _dice_partial_kernel,
        out_shape=(
            jax.ShapeDtypeStruct((NCORES, B, C), jnp.float32),
            jax.ShapeDtypeStruct((NCORES, B, C), jnp.float32),
        ),
        grid_spec=pltpu.PrefetchScalarGridSpec(
            num_scalar_prefetch=0,
            grid=(NCORES, tiles_per_core),
            in_specs=[
                pl.BlockSpec((B, C, tile_s),
                             lambda c, t: (0, 0, c * tiles_per_core + t)),
                pl.BlockSpec((B, tile_s),
                             lambda c, t: (0, c * tiles_per_core + t)),
            ],
            out_specs=[
                pl.BlockSpec((1, B, C), lambda c, t: (c, 0, 0)),
                pl.BlockSpec((1, B, C), lambda c, t: (c, 0, 0)),
            ],
        ),
        compiler_params=pltpu.CompilerParams(
            dimension_semantics=("parallel", "arbitrary")),
    )(pred3, lab2)

    out = pl.pallas_call(
        _dice_finalize_kernel,
        out_shape=jax.ShapeDtypeStruct((1, 1), jnp.float32),
        in_specs=[
            pl.BlockSpec(memory_space=pltpu.MemorySpace.VMEM),
            pl.BlockSpec(memory_space=pltpu.MemorySpace.VMEM),
        ],
        out_specs=pl.BlockSpec(memory_space=pltpu.MemorySpace.VMEM),
    )(inter_part, comb_part)
    return out[0, 0]


def _dice_loss_ref(y_pred, y_true):
    # pure-JAX reference mirroring the PyTorch module
    onehot = jax.nn.one_hot(y_true, NUM_CLASSES, dtype=jnp.float32)   # (B,H,W,C)
    onehot = jnp.transpose(onehot, (0, 3, 1, 2))                      # (B,C,H,W)
    sm = jax.nn.softmax(y_pred.astype(jnp.float32), axis=1)
    inter = jnp.sum(sm * onehot, axis=(2, 3))
    combined = jnp.sum(sm + onehot, axis=(2, 3))
    dice = 1.0 - (2.0 * inter + SMOOTH) / (combined + SMOOTH + EPS)
    return jnp.mean(dice)


if __name__ == "__main__":
    key = jax.random.PRNGKey(0)
    k1, k2 = jax.random.split(key)
    B, C, H, W = 2, NUM_CLASSES, 16, 16
    y_pred = jax.random.normal(k1, (B, C, H, W), dtype=jnp.float32)
    y_true = jax.random.randint(k2, (B, H, W), 0, NUM_CLASSES, dtype=jnp.int32)

    loss = dice_loss(y_pred, y_true)
    jax.block_until_ready(loss)

    ref = _dice_loss_ref(y_pred, y_true)
    # tolerance relaxed (vs 1e-5) because the softmax denominator uses the
    # approximate EUP reciprocal (pl.reciprocal(..., approx=True)).
    assert jnp.allclose(loss, ref, rtol=5e-3, atol=5e-3), (loss, ref)
    print("KERNEL_OK")
</pallas_src>

<mosaic_0001>
module attributes {stable_mosaic.version = 11 : i64} {
  func.func @_dice_partial_kernel(%arg0: i32, %arg1: i32, %arg2: memref<2x4x128xf32, #tpu.memory_space<vmem>>, %arg3: memref<2x128xi32, #tpu.memory_space<vmem>>, %arg4: memref<1x2x4xf32, #tpu.memory_space<vmem>>, %arg5: memref<1x2x4xf32, #tpu.memory_space<vmem>>) attributes {dimension_semantics = [#tpu.dimension_semantics<parallel>, #tpu.dimension_semantics<arbitrary>], iteration_bounds = array<i64: 2, 1>, scalar_prefetch = 0 : i64, scratch_operands = 0 : i64, tpu.core_type = #tpu.core_type<tc>, window_params = [{transform_indices = @transform_0, window_bounds = array<i64: 2, 4, 128>}, {transform_indices = @transform_1, window_bounds = array<i64: 2, 128>}, {transform_indices = @transform_2, window_bounds = array<i64: 1, 2, 4>}, {transform_indices = @transform_3, window_bounds = array<i64: 1, 2, 4>}]} {
    %c0_i32 = arith.constant 0 : i32
    %0 = arith.cmpi eq, %arg1, %c0_i32 : i32
    %1 = arith.extui %0 : i1 to i32
    %c0_i32_0 = arith.constant 0 : i32
    %2 = arith.cmpi ne, %1, %c0_i32_0 : i32
    scf.if %2 {
      %cst_24 = arith.constant 0.000000e+00 : f32
      %42 = vector.broadcast %cst_24 : f32 to vector<1x2x4xf32>
      %c0_25 = arith.constant 0 : index
      %c0_26 = arith.constant 0 : index
      %c0_27 = arith.constant 0 : index
      %43 = vector.load %arg4[%c0_25, %c0_26, %c0_27] : memref<1x2x4xf32, #tpu.memory_space<vmem>>, vector<1x2x4xf32>
      tpu.vector_store %arg4[%c0_25, %c0_26, %c0_27], %42 {strides = array<i32>} : memref<1x2x4xf32, #tpu.memory_space<vmem>>, vector<1x2x4xf32>,
      %cst_28 = arith.constant 0.000000e+00 : f32
      %44 = vector.broadcast %cst_28 : f32 to vector<1x2x4xf32>
      %c0_29 = arith.constant 0 : index
      %c0_30 = arith.constant 0 : index
      %c0_31 = arith.constant 0 : index
      %45 = vector.load %arg5[%c0_29, %c0_30, %c0_31] : memref<1x2x4xf32, #tpu.memory_space<vmem>>, vector<1x2x4xf32>
      tpu.vector_store %arg5[%c0_29, %c0_30, %c0_31], %44 {strides = array<i32>} : memref<1x2x4xf32, #tpu.memory_space<vmem>>, vector<1x2x4xf32>,
    } else {
    }
    %c0 = arith.constant 0 : index
    %c0_1 = arith.constant 0 : index
    %c0_2 = arith.constant 0 : index
    %3 = vector.load %arg2[%c0, %c0_1, %c0_2] : memref<2x4x128xf32, #tpu.memory_space<vmem>>, vector<2x4x128xf32>
    %c0_3 = arith.constant 0 : index
    %c0_4 = arith.constant 0 : index
    %4 = vector.load %arg3[%c0_3, %c0_4] : memref<2x128xi32, #tpu.memory_space<vmem>>, vector<2x128xi32>
    %cst = arith.constant dense<0xFF800000> : vector<2x128xf32>
    %5 = vector.multi_reduction <maximumf>, %3, %cst [1] : vector<2x4x128xf32> to vector<2x128xf32>
    %6 = vector.shape_cast %5 : vector<2x128xf32> to vector<2x1x128xf32>
    %7 = vector.broadcast %6 : vector<2x1x128xf32> to vector<2x4x128xf32>
    %8 = arith.subf %3, %7 : vector<2x4x128xf32>
    %9 = math.exp %8 : vector<2x4x128xf32>
    %cst_5 = arith.constant dense<0.000000e+00> : vector<2x128xf32>
    %10 = vector.multi_reduction <add>, %9, %cst_5 [1] : vector<2x4x128xf32> to vector<2x128xf32>
    %11 = vector.shape_cast %10 : vector<2x128xf32> to vector<2x1x128xf32>
    %12 = tpu.reciprocal %11 {approx = true} : vector<2x1x128xf32> -> vector<2x1x128xf32>
    %13 = vector.broadcast %12 : vector<2x1x128xf32> to vector<2x4x128xf32>
    %14 = arith.mulf %9, %13 : vector<2x4x128xf32>
    %15 = tpu.iota {dimensions = array<i32: 1>} : vector<2x4x128xi32>
    %16 = vector.shape_cast %4 : vector<2x128xi32> to vector<2x1x128xi32>
    %17 = vector.broadcast %16 : vector<2x1x128xi32> to vector<2x4x128xi32>
    %18 = arith.cmpi eq, %17, %15 : vector<2x4x128xi32>
    %c0_i32_6 = arith.constant 0 : i32
    %19 = vector.broadcast %c0_i32_6 : i32 to vector<2x128xi32>
    %20 = arith.cmpi sge, %4, %19 : vector<2x128xi32>
    %21 = vector.shape_cast %20 : vector<2x128xi1> to vector<2x1x128xi1>
    %cst_7 = arith.constant 0.000000e+00 : f32
    %22 = vector.broadcast %cst_7 : f32 to vector<2x4x128xf32>
    %23 = arith.select %18, %14, %22 : vector<2x4x128xi1>, vector<2x4x128xf32>
    %cst_8 = arith.constant dense<0.000000e+00> : vector<2x4xf32>
    %24 = vector.multi_reduction <add>, %23, %cst_8 [2] : vector<2x4x128xf32> to vector<2x4xf32>
    %cst_9 = arith.constant 0.000000e+00 : f32
    %25 = vector.shape_cast %21 : vector<2x1x128xi1> to vector<2x1x128xi1>
    %26 = vector.broadcast %25 : vector<2x1x128xi1> to vector<2x4x128xi1>
    %27 = vector.broadcast %cst_9 : f32 to vector<2x4x128xf32>
    %28 = arith.select %26, %14, %27 : vector<2x4x128xi1>, vector<2x4x128xf32>
    %cst_10 = arith.constant dense<0.000000e+00> : vector<2x4xf32>
    %29 = vector.multi_reduction <add>, %28, %cst_10 [2] : vector<2x4x128xf32> to vector<2x4xf32>
    %30 = arith.extui %18 : vector<2x4x128xi1> to vector<2x4x128xi32>
    %31 = arith.sitofp %30 : vector<2x4x128xi32> to vector<2x4x128xf32>
    %cst_11 = arith.constant dense<0.000000e+00> : vector<2x4xf32>
    %32 = vector.multi_reduction <add>, %31, %cst_11 [2] : vector<2x4x128xf32> to vector<2x4xf32>
    %33 = arith.addf %29, %32 : vector<2x4xf32>
    %c0_12 = arith.constant 0 : index
    %c0_13 = arith.constant 0 : index
    %c0_14 = arith.constant 0 : index
    %34 = vector.load %arg4[%c0_12, %c0_13, %c0_14] : memref<1x2x4xf32, #tpu.memory_space<vmem>>, vector<1x2x4xf32>
    %35 = vector.shape_cast %24 : vector<2x4xf32> to vector<1x2x4xf32>
    %36 = arith.addf %34, %35 : vector<1x2x4xf32>
    %c0_15 = arith.constant 0 : index
    %c0_16 = arith.constant 0 : index
    %c0_17 = arith.constant 0 : index
    %37 = vector.load %arg4[%c0_15, %c0_16, %c0_17] : memref<1x2x4xf32, #tpu.memory_space<vmem>>, vector<1x2x4xf32>
    tpu.vector_store %arg4[%c0_15, %c0_16, %c0_17], %36 {strides = array<i32>} : memref<1x2x4xf32, #tpu.memory_space<vmem>>, vector<1x2x4xf32>,
    %c0_18 = arith.constant 0 : index
    %c0_19 = arith.constant 0 : index
    %c0_20 = arith.constant 0 : index
    %38 = vector.load %arg5[%c0_18, %c0_19, %c0_20] : memref<1x2x4xf32, #tpu.memory_space<vmem>>, vector<1x2x4xf32>
    %39 = vector.shape_cast %33 : vector<2x4xf32> to vector<1x2x4xf32>
    %40 = arith.addf %38, %39 : vector<1x2x4xf32>
    %c0_21 = arith.constant 0 : index
    %c0_22 = arith.constant 0 : index
    %c0_23 = arith.constant 0 : index
    %41 = vector.load %arg5[%c0_21, %c0_22, %c0_23] : memref<1x2x4xf32, #tpu.memory_space<vmem>>, vector<1x2x4xf32>
    tpu.vector_store %arg5[%c0_21, %c0_22, %c0_23], %40 {strides = array<i32>} : memref<1x2x4xf32, #tpu.memory_space<vmem>>, vector<1x2x4xf32>,
    return
  }
  func.func @transform_0(%arg0: i32, %arg1: i32) -> (i32, i32, i32) {
    %c1_i32 = arith.constant 1 : i32
    %0 = arith.muli %arg0, %c1_i32 : i32
    %1 = arith.addi %0, %arg1 : i32
    %c0_i32 = arith.constant 0 : i32
    %c0_i32_0 = arith.constant 0 : i32
    %c0_i32_1 = arith.constant 0 : i32
    return %c0_i32, %c0_i32_0, %1 : i32, i32, i32
  }
  func.func @transform_1(%arg0: i32, %arg1: i32) -> (i32, i32) {
    %c1_i32 = arith.constant 1 : i32
    %0 = arith.muli %arg0, %c1_i32 : i32
    %1 = arith.addi %0, %arg1 : i32
    %c0_i32 = arith.constant 0 : i32
    %c0_i32_0 = arith.constant 0 : i32
    return %c0_i32, %1 : i32, i32
  }
  func.func @transform_2(%arg0: i32, %arg1: i32) -> (i32, i32, i32) {
    %c0_i32 = arith.constant 0 : i32
    %c0_i32_0 = arith.constant 0 : i32
    %c0_i32_1 = arith.constant 0 : i32
    return %arg0, %c0_i32, %c0_i32_0 : i32, i32, i32
  }
  func.func @transform_3(%arg0: i32, %arg1: i32) -> (i32, i32, i32) {
    %c0_i32 = arith.constant 0 : i32
    %c0_i32_0 = arith.constant 0 : i32
    %c0_i32_1 = arith.constant 0 : i32
    return %arg0, %c0_i32, %c0_i32_0 : i32, i32, i32
  }
}

</mosaic_0001>

<bundles_post_ra>
// kernel: tpu_custom_call.1
= control target key start
LH: loop header
LB: loop body
LE: loop exit
PB: predicated region body
PF: predicated region fallthrough
CT: control target
= control target key end

     0   :  { %s1068_s0 = inlined_call_operand.hbm [shape: f32[2,4,256], index: 0, kind: input, shape index: {}]   ;;  %s1069_s1 = inlined_call_operand.hbm [shape: s32[2,256], index: 1, kind: input, shape index: {}]   ;;  %s1070_s2 = inlined_call_operand.hbm [shape: f32[2,2,4], index: 2, kind: output, shape index: {0}]   ;;  %s1071_s3 = inlined_call_operand.hbm [shape: f32[2,2,4], index: 3, kind: output, shape index: {1}]  }
   0x1   :  { %1072 = sst [smem:[#allocation14_spill]] %s1068_s0 }
   0x2   :  { %9 = vsyncpa [#allocation3], 0 }
   0x3   :  { %11 = vsyncpa [#allocation3 + $0x1], 0 }
   0x4   :  { %12 = vsyncpa [#allocation6], 0 }
   0x5   :  { %14 = vsyncpa [#allocation6 + $0x1], 0 }
   0x6   :  { %15 = vsyncpa [#allocation4], 0 }
   0x7   :  { %17 = vsyncpa [#allocation4 + $0x1], 0 }
   0x8   :  { %18 = vsyncpa [#allocation9], 0 }
   0x9   :  { %20 = vsyncpa [#allocation9 + $0x1], 0  ;;  %s857_s12 = smov 0   ;;  %s859_s13 = smov 0  }
   0xa   :  { %s861_s14 = smov 0   ;;  %s863_s15 = smov 0  }
   0xb   :  { %s865_s16 = smov 0   ;;  %s867_s17 = smov 0  }
   0xc LB: > { %s546_s18 = sadd.s32 4294967295, %s830_s17   ;;  %s547_s19 = sadd.s32 4294967294, %s830_s17   ;;  %s830_s17 = sphi %s867_s17, %s26_s17   ;;  %s826_s16 = sphi %s865_s16, %s1085_s16   ;;  %s822_s15 = sphi %s863_s15, %s1084_s15   ;;  %s818_s14 = sphi %s861_s14, %s1083_s14   ;;  %s814_s13 = sphi %s859_s13, %s1082_s13   ;;  %s810_s12 = sphi %s857_s12, %s1081_s12  }
   0xd   : > { %s38_s20 = sadd.s32 1, %s826_s16  ;;  %s47_s21 = sadd.s32 1, %s818_s14 }
   0xe   : > { %p40_p0 = scmp.ge.s32.totalorder %s38_s20, 2  ;;  %p54_p1 = scmp.ne.s32.totalorder %s818_s14, %s814_s13 }
   0xf   : > { %p55_p2 = scmp.eq.s32.totalorder %s830_s17, 0  ;;  %p60_p3 = scmp.ne.s32.totalorder %s814_s13, %s810_s12 }
  0x10   : > { %s1087_s20 = smov (%p40_p0, %s38_s20), 0  ;;  %p61_p5 = scmp.eq.s32.totalorder %s546_s18, 0 }
  0x11   : > { %p898_p4 = por %p55_p2, %p54_p1  ;;  %s44_s23 = ssub.s32 %s826_s16, %s1087_s20 }
  0x12   : > { %p112_p6 = scmp.eq.s32.totalorder %s546_s18, 1  ;;  %p45_p7 = scmp.eq.s32.totalorder %s44_s23, 0 }
  0x13   : > { %p904_p8 = por %p61_p5, %p60_p3  ;;  %p118_p10 = scmp.eq.s32.totalorder %s547_s19, 1 }
  0x14   : > { %p908_p9 = por %p112_p6, %p54_p1  ;;  %p549_p12 = scmp.ge.s32.totalorder %s830_s17, 2 }
  0x15   : > { %s913_s26 = scalar_select %p45_p7, %s818_s14, %s47_s21  }
  0x16   : > { %p915_p11 = por %p118_p10, %p60_p3  ;;  %p589_p13 = scmp.lt.s32.totalorder %s830_s17, 2 }
  0x17   : > { %s922_s28 = sand.u32 1, %s818_s14   ;;  %s551_s30 = sshll.u32 %s826_s16, 2 }
  0x18   : > { %s550_s29 = sshll.u32 %s922_s28, 3  ;;  %s1077_s0 = sld [smem:[#allocation14_spill]] }
  0x19   : > { %s168_s7 = scalar_lea.vmem [#allocation2], %s550_s29  ;;  %p931_p0 = pnand %p589_p13, %p898_p4 }
  0x1a   : > { %s176_s8 = sshll.u32 %s168_s7, 4  ;;  %s165_s11 = scalar_lea.sflag [#allocation3], %s922_s28  ;;  %s177_s8 = int_to_ptr.vmem [resolvable:$true] %s176_s8 }
  0x1b   : > { %s832_s18 = smov 128   ;;  %s833_s19 = smov 64  }
  0x1c   : > { %s834_s21 = smov 4   ;;  %p554_p1 = scmp.ge.s32.totalorder %s830_s17, 1 }
  0x1d   : > { %p204_p2 = scmp.lt.s32.totalorder %s830_s17, 3  ;;  %s552_s23 = sshll.u32 %s922_s28, 1 }
  0x1e   : > { %s173_s6 = scalar_lea.hbm %s1077_s0, %s551_s30  ;;  %s553_s29 = sshll.u32 %s826_s16, 1 }
  0x1f   : > { %s174_s9 = sshll.u32 %s173_s6, 4  ;;  %p205_p3 = pnand %p554_p1, %p204_p2  ;;  %s175_s9 = int_to_ptr.hbm [resolvable:$true] %s174_s9 }
  0x20   : > { %578 = dma.hbm_to_vmem [thread:$0]  (!%p931_p0), %s175_s9, 128, %s177_s8, %s165_s11, %s832_s18, %s833_s19, %s834_s21  }
  0x21   : > { %s190_s30 = scalar_lea.vmem [#allocation5], %s552_s23  ;;  %s195_s6 = scalar_lea.hbm %s1069_s1, %s553_s29 }
  0x22   : > { %s199_s22 = sshll.u32 %s190_s30, 4  ;;  %s197_s7 = sshll.u32 %s195_s6, 4  ;;  %s200_s22 = int_to_ptr.vmem [resolvable:$true] %s199_s22  ;;  %s198_s7 = int_to_ptr.hbm [resolvable:$true] %s197_s7 }
  0x23   : > { %s187_s0 = scalar_lea.sflag [#allocation6], %s922_s28  ;;  %208 = sbr.rel (%p205_p3) target bundleno = 239 (0xef), region = 28 }
  0x24   : > { %581 = dma.hbm_to_vmem [thread:$0]  (!%p931_p0), %s198_s7, 32, %s200_s22, %s187_s0  }
  0x25   : > { %s949_s8 = sand.u32 (!%p205_p3), 1, %s814_s13  }
  0x26   : > { %s555_s9 = sshll.u32 (!%p205_p3), %s949_s8, 3  ;;  %s211_s11 = scalar_lea.sflag (!%p205_p3), [#allocation3], %s949_s8 }
  0x27   : > { %s214_s18 = scalar_lea.vmem (!%p205_p3), [#allocation2], %s555_s9 }
  0x28   : > { %793 = dma.done.wait (%p904_p8), %s211_s11, 128  }
  0x29   : > { %795 = vsyncadd (%p904_p8), %s211_s11, 4294967168  ;;  %s556_s28 = sshll.u32 %s949_s8, 1  ;;  %s221_s0 = scalar_lea.sflag [#allocation6], %s949_s8 }
  0x2a   : > { %s224_s10 = scalar_lea.vmem [#allocation5], %s556_s28 }
  0x2b   : > { %797 = dma.done.wait (%p904_p8), %s221_s0, 32  }
  0x2c   : > { %799 = vsyncadd (%p904_p8), %s221_s0, 4294967264  ;;  %vm264_vm0 = vcmask 25600   ;;  %s963_s19 = scalar_lea.vmem [#allocation7], %s556_s28  ;;  %v835_v0 = vmov 0.0   ;;  %v309_v1 = vlaneseq  ;;  %s967_s21 = scalar_lea.vmem [#allocation8], %s556_s28  ;;  %vm270_vm1 = vcmask 1043456  }
  0x2d   : > { %265 = vst.msk [vmem:[%s963_s19] sm:$0x3] %vm264_vm0, %v835_v0  ;;  %v269_v3 = vld [vmem:[%s224_s10] sm:$0x3]  ;;  %v267_v4 = vld [vmem:[%s214_s18] sm:$0xf] }
  0x2e   : > { %266 = vst.msk [vmem:[%s967_s21] sm:$0x3] %vm264_vm0, %v835_v0  ;;  %v972_v2 = vshrl.u32 %v309_v1, 7  ;;  %v268_v5 = vld [vmem:[%s214_s18 + $0x4] sm:$0xf]  ;;  %v312_v6 = vperm.slane %v269_v3, 0 }
  0x2f   : > { %v271_v7 = vsel %vm270_vm1, %v267_v4, -inf  ;;  %v278_v8 = vsel %vm270_vm1, %v268_v5, -inf  ;;  %v311_v28 = vrot.slane %v269_v3, 1  ;;  %vm316_vm4 = vcmp.ge.s32.totalorder %v269_v3, 0  ;;  %s563_s24 = sshll.u32 %s822_s15, 1  ;;  %s393_s15 = sshll.u32 %s963_s19, 4  ;;  %s394_s15 = int_to_ptr.vmem [resolvable:$true] %s393_s15 }
  0x30   : > { %v272_v9 = vrot.slane %v271_v7, 4  ;;  %v279_v10 = vrot.slane %v278_v8, 4  ;;  %vm977_vm2 = vcmp.eq.s32.totalorder %v312_v6, %v972_v2  ;;  %v836_v43 = vmov 0   ;;  %s391_s30 = scalar_lea.hbm %s1070_s2, %s563_s24  ;;  %s405_s5 = scalar_lea.hbm %s1071_s3, %s563_s24 }
  0x31   : > { %v559_v12 = vsel %vm977_vm2, 1.0, %v835_v0  ;;  %v313_v29 = vperm.slane %v311_v28, 0  ;;  %v317_v44 = vsel %vm316_vm4, 1, %v836_v43  ;;  %vm360_vm8 = vcmask 1041409   ;;  %s395_s6 = sshll.u32 %s391_s30, 4  ;;  %s407_s7 = sshll.u32 %s967_s21, 4  ;;  %s396_s6 = int_to_ptr.hbm [resolvable:$true] %s395_s6  ;;  %s1014_s7 = int_to_ptr.vmem [resolvable:$true] %s407_s7 }
  0x32   : > { %v273_v13 = vmax.f32 %v271_v7, %v272_v9  ;;  %v280_v14 = vmax.f32 %v278_v8, %v279_v10  ;;  %v345_v15 = vsel %vm270_vm1, %v559_v12, 0.0  ;;  %v318_v47 = vrot.slane %v317_v44, 1  ;;  %s409_s9 = sshll.u32 %s405_s5, 4  ;;  %s376_s11 = scalar_lea.sflag [#allocation4], %s949_s8  ;;  %s1016_s9 = int_to_ptr.hbm [resolvable:$true] %s409_s9 }
  0x33   : > { %346 = vadd.xlane.f32.xlu1 %v345_v15  ;;  %vm315_vm3 = vcmp.eq.s32.totalorder %v313_v29, %v972_v2  ;;  %v329_v51 = vperm.slane %v317_v44, 0  ;;  %v357_v7 = vand.u32 127, %v309_v1  ;;  %s726_s18 = sshra.s32 %s396_s6, 4  ;;  %s732_s24 = scalar_lea.hbm %s1070_s2, 4  ;;  %s727_s18 = int_to_ptr.hbm [resolvable:$true] %s726_s18 }
  0x34   : > { %v274_v16 = vrot.slane %v273_v13, 2  ;;  %v281_v17 = vrot.slane %v280_v14, 2  ;;  %v560_v30 = vsel %vm315_vm3, 1.0, %v835_v0  ;;  %vm319_vm5 = vcmp.ne.s32.totalorder %v318_v47, 0  ;;  %s728_s28 = scalar_lea.hbm %s727_s18, 2  ;;  %p733_p7 = scmp.lt.s32.totalorder %s727_s18, %s1070_s2 }
  0x35   : > { %v348_v31 = vsel %vm270_vm1, %v560_v30, 0.0  ;;  %v328_v52 = vsel %vm319_vm5, 1, %v836_v43  ;;  %vm331_vm6 = vcmp.eq.s32.totalorder %v329_v51, 1  ;;  %v366_v15 = vld [vmem:[%s967_s21] sm:$0x3]  ;;  %p729_p4 = scmp.ne.s32.totalorder %s727_s18, %s728_s28  ;;  %p734_p8 = scmp.lt.s32.totalorder %s732_s24, %s728_s28 }
  0x36   : > { %v275_v18 = vmax.f32 %v273_v13, %v274_v16  ;;  %v282_v19 = vmax.f32 %v280_v14, %v281_v17  ;;  %v330_v54 = vperm.slane %v328_v52, 0  ;;  %v353_v13 = vld [vmem:[%s963_s19] sm:$0x3] }
  0x37   : > { %p730_p5 = pnand %p729_p4, %p908_p9  ;;  %p735_p10 = por %p734_p8, %p733_p7 }
  0x38   : > { %v276_v20 = vrot.slane %v275_v18, 1  ;;  %v283_v21 = vrot.slane %v282_v19, 1  ;;  %vm332_vm7 = vcmp.eq.s32.totalorder %v330_v54, 1 }
  0x39   : > { %p731_p6 = pneg %p730_p5 }
  0x3a   : > { %v277_v22 = vmax.f32 %v275_v18, %v276_v20  ;;  %v284_v23 = vmax.f32 %v282_v19, %v283_v21 }
  0x3b   : > { %349 = vadd.xlane.f32.xlu1 %v348_v31  ;;  %p736_p13 = pnand %p735_p10, %p731_p6 }
  0x3c   : > { %v285_v24 = vsub.f32 %v267_v4, %v277_v22  ;;  %v286_v25 = vsub.f32 %v268_v5, %v284_v23 }
  0x3e   : > { %v287_v26 = vmul.f32 1.442695, %v285_v24  ;;  %v289_v27 = vmul.f32 1.442695, %v286_v25 }
  0x40   : > { %644 = vpow2.f32 %v287_v26 }
  0x41   : > { %646 = vpow2.f32 %v289_v27 }
  0x46   : > { %v645_v32 = vpop.eup %644 }
  0x47   : > { %v647_v33 = vpop.eup %646  ;;  %v291_v34 = vsel %vm270_vm1, %v645_v32, 0.0 }
  0x48   : > { %v292_v35 = vrot.slane %v291_v34, 4  ;;  %v298_v36 = vsel %vm270_vm1, %v647_v33, 0.0 }
  0x49   : > { %v299_v37 = vrot.slane %v298_v36, 4 }
  0x4a   : > { %v293_v38 = vadd.f32 %v292_v35, %v291_v34 }
  0x4b   : > { %v300_v39 = vadd.f32 %v299_v37, %v298_v36 }
  0x4c   : > { %v294_v40 = vrot.slane %v293_v38, 2 }
  0x4d   : > { %v301_v41 = vrot.slane %v300_v39, 2 }
  0x4e   : > { %v295_v42 = vadd.f32 %v294_v40, %v293_v38 }
  0x4f   : > { %v302_v45 = vadd.f32 %v301_v41, %v300_v39 }
  0x50   : > { %v296_v46 = vrot.slane %v295_v42, 1 }
  0x51   : > { %v303_v48 = vrot.slane %v302_v45, 1 }
  0x52   : > { %v297_v49 = vadd.f32 %v296_v46, %v295_v42 }
  0x53   : > { %v304_v50 = vadd.f32 %v303_v48, %v302_v45 }
  0x54   : > { %648 = vrcp.f32 %v297_v49 }
  0x55   : > { %650 = vrcp.f32 %v304_v50 }
  0x5a   : > { %v649_v53 = vpop.eup %648 }
  0x5b   : > { %v651_v55 = vpop.eup %650  ;;  %v307_v56 = vmul.f32 %v649_v53, %v645_v32 }
  0x5c   : > { %v308_v59 = vmul.f32 %v651_v55, %v647_v33 }
  0x5d   : > { %v333_v57 = vsel %vm331_vm6, %v307_v56, 0.0  ;;  %v320_v58 = vsel %vm977_vm2, %v307_v56, 0.0 }
  0x5e   : > { %v335_v60 = vsel %vm270_vm1, %v333_v57, 0.0  ;;  %v322_v61 = vsel %vm270_vm1, %v320_v58, 0.0  ;;  %v334_v62 = vsel %vm332_vm7, %v308_v59, 0.0  ;;  %v321_v63 = vsel %vm315_vm3, %v308_v59, 0.0 }
  0x5f   : > { %336 = vadd.xlane.f32.xlu0 %v335_v60  ;;  %323 = vadd.xlane.f32.xlu2 %v322_v61  ;;  %v338_v0 = vsel %vm270_vm1, %v334_v62, 0.0  ;;  %v325_v3 = vsel %vm270_vm1, %v321_v63, 0.0 }
  0x67   : > { %339 = vadd.xlane.f32.xlu0 %v338_v0  ;;  %326 = vadd.xlane.f32.xlu2 %v325_v3 }
  0xa6   : > { %v347_v4 = vpop.xlane.xlu1 %346 }
  0xae   : > { %v350_v8 = vpop.xlane.xlu1 %349 }
  0xd2   : > { %v337_v5 = vpop.xlane.xlu0 %336  ;;  %v324_v6 = vpop.xlane.xlu2 %323 }
  0xd3   : > { %v351_v2 = vadd.f32 %v347_v4, %v337_v5  ;;  %v358_v11 = vperm.slane %v324_v6, %v357_v7 }
  0xd5   : > { %v369_v1 = vperm.slane %v351_v2, %v357_v7 }
  0xda   : > { %v340_v9 = vpop.xlane.xlu0 %339  ;;  %v327_v10 = vpop.xlane.xlu2 %326 }
  0xdb   : > { %v352_v12 = vadd.f32 %v350_v8, %v340_v9  ;;  %v359_v14 = vperm.slane %v327_v10, %v357_v7 }
  0xdd   : > { %v370_v16 = vperm.slane %v352_v12, %v357_v7  ;;  %v361_v17 = vsel %vm360_vm8, %v359_v14, %v358_v11 }
  0xde   : > { %v363_v18 = vadd.f32 %v361_v17, %v353_v13 }
  0xdf   : > { %v371_v19 = vsel %vm360_vm8, %v370_v16, %v369_v1 }
  0xe0   : > { %v373_v20 = vadd.f32 %v371_v19, %v366_v15  ;;  %365 = vst.msk [vmem:[%s963_s19] sm:$0x3] %vm264_vm0, %v363_v18 }
  0xe1   : > { %739 = shalt.err (!%p736_p13)
}
  0xe2   : > { %571 = dma.vmem_to_hbm [thread:$0]  (%p908_p9), %s394_s15, 32, %s396_s6, %s376_s11   ;;  %374 = vst.msk [vmem:[%s967_s21] sm:$0x3] %vm264_vm0, %v373_v20 }
  0xe3   : > { %s381_s19 = scalar_lea.sflag [#allocation9], %s949_s8  ;;  %s754_s30 = sshra.s32 %s1016_s9, 4  ;;  %s755_s30 = int_to_ptr.hbm [resolvable:$true] %s754_s30 }
  0xe4   : > { %s756_s22 = scalar_lea.hbm %s755_s30, 2  ;;  %s760_s18 = scalar_lea.hbm %s1071_s3, 4 }
  0xe5   : > { %p757_p0 = scmp.ne.s32.totalorder %s755_s30, %s756_s22  ;;  %p761_p3 = scmp.lt.s32.totalorder %s755_s30, %s1071_s3 }
  0xe6   : > { %p762_p4 = scmp.lt.s32.totalorder %s760_s18, %s756_s22 }
  0xe7   : > { %p758_p1 = pnand %p757_p0, %p908_p9 }
  0xe8   : > { %p763_p5 = por %p762_p4, %p761_p3 }
  0xe9   : > { %p759_p2 = pneg %p758_p1 }
  0xeb   : > { %p764_p6 = pnand %p763_p5, %p759_p2 }
  0xed   : > { %767 = shalt.err (!%p764_p6)
}
  0xee   : > { %572 = dma.vmem_to_hbm [thread:$0]  (%p908_p9), %s1014_s7, 32, %s1016_s9, %s381_s19  }
  0xef PF: > { %s421_s8 = sand.u32 1, %s810_s12   ;;  %p583_p7 = pnand %p549_p12, %p915_p11 }
  0xf0   : > { %s422_s21 = scalar_lea.sflag [#allocation4], %s421_s8 }
  0xf1   : > { %p584_p8 = pneg %p583_p7 }
  0xf3   : > { %801 = dma.done.wait (%p584_p8), %s422_s21, 32  }
  0xf4   : > { %803 = vsyncadd (%p584_p8), %s422_s21, 4294967264  ;;  %s432_s15 = scalar_lea.sflag [#allocation9], %s421_s8 }
  0xf5   : > { %805 = dma.done.wait (%p584_p8), %s432_s15, 32  }
  0xf6   : > { %807 = vsyncadd (%p584_p8), %s432_s15, 4294967264  ;;  %s26_s17 = sadd.s32 1, %s830_s17   ;;  %s1081_s12 = smov %s814_s13 }
  0xf7   : > { %p23_p10 = scmp.ge.s32.totalorder %s26_s17, 4   ;;  %s1082_s13 = smov %s818_s14 }
  0xf8   : > { %s1083_s14 = smov %s913_s26  ;;  %s1084_s15 = smov %s826_s16 }
  0xf9   : > { %s1085_s16 = smov %s1087_s20  ;;  %25 = sbr.rel (!%p23_p10) target bundleno = 12 (0xc), region = 107 }
  0xfe   :  { %438 = vsyncpa [#allocation3], 1 }
  0xff   :  { %440 = vsyncpa [#allocation3 + $0x1], 1 }
 0x100   :  { %441 = vsyncpa [#allocation6], 1 }
 0x101   :  { %443 = vsyncpa [#allocation6 + $0x1], 1 }
 0x102   :  { %444 = vsyncpa [#allocation4], 1 }
 0x103   :  { %446 = vsyncpa [#allocation4 + $0x1], 1 }
 0x104   :  { %447 = vsyncpa [#allocation9], 1 }
 0x105   :  { %449 = vsyncpa [#allocation9 + $0x1], 1 }

</bundles_post_ra>
